<compile_context>
chip_gen: v6e
topology: v6e:2x2x1
jax: 0.10.0
libtpu: 0.0.40
codegen_flags: <defaults>
</compile_context>

<pallas_src>
import functools

import jax
import jax.numpy as jnp
from jax.experimental import pallas as pl
from jax.experimental.pallas import tpu as pltpu

LANE = 128
SUBLANE = 8


def _smooth_l1_kernel(pred_ref, target_ref, out_ref, sum_acc, cnt_acc,
                      *, beta, n_blocks, tile_rows):
    s = pl.program_id(0)            # "parallel" split (megacore on v7x)
    i = pl.program_id(1)            # "arbitrary" reduction axis
    n_inner = pl.num_programs(1)

    @pl.when(i == 0)
    def _init():
        sum_acc[...] = jnp.zeros_like(sum_acc)
        cnt_acc[...] = jnp.zeros_like(cnt_acc)

    blk = s * n_inner + i           # global block id; >= n_blocks means grid padding

    @pl.when(blk < n_blocks)
    def _accum():
        t = target_ref[...].astype(jnp.float32)
        p = pred_ref[...].astype(jnp.float32)
        valid = t > 0.0                               # valid_mask = (target > 0)
        diff = jnp.abs(t - p)
        elem = jnp.where(diff < beta, 0.5 * diff * diff, diff - 0.5 * beta)
        elem = jnp.where(valid, elem, 0.0)
        cnt = valid.astype(jnp.float32)
        # Fold (tile_rows,128) -> (8,128): vreg-wise VPU adds only, no cross-lane
        # reduce and no vector->scalar->SMEM round trip per step.
        g = tile_rows // SUBLANE
        sum_acc[...] += jnp.sum(elem.reshape(g, SUBLANE, LANE), axis=0)
        cnt_acc[...] += jnp.sum(cnt.reshape(g, SUBLANE, LANE), axis=0)

    @pl.when(i == n_inner - 1)
    def _write():
        out_ref[0, 0] = sum_acc[...]
        out_ref[0, 1] = cnt_acc[...]


def _masked_sum_count(pred_flat, target_flat, beta):
    """Plain-jnp masked sum/count (used for tiny inputs and the ragged tail)."""
    t = target_flat.astype(jnp.float32)
    p = pred_flat.astype(jnp.float32)
    valid = t > 0.0
    diff = jnp.abs(t - p)
    elem = jnp.where(diff < beta, 0.5 * diff * diff, diff - 0.5 * beta)
    return (jnp.sum(jnp.where(valid, elem, 0.0)),
            jnp.sum(valid.astype(jnp.float32)))


def smooth_l1_loss(pred, target, beta=1.0, tile_rows=2048, n_split=2):
    """Pallas TPU implementation of the masked SmoothL1Loss forward pass."""
    assert pred.shape == target.shape
    total = pred.size
    p_flat = pred.reshape(-1)
    t_flat = target.reshape(-1)

    rows = total // LANE
    if rows < SUBLANE:
        # Too small for even one TPU tile; pure jnp path.
        s, c = _masked_sum_count(p_flat, t_flat, beta)
        return 2.0 * s / c

    # Effective block rows: multiple of 8, at most `rows`, at most `tile_rows`.
    tr = min(tile_rows, (rows // SUBLANE) * SUBLANE)
    n_blocks = rows // tr
    main = n_blocks * tr * LANE       # elements handled by the kernel (full blocks)

    if main < total:
        # Ragged case: prefix slice for the kernel (XLA copy only on this path);
        # the tail (< one block) is reduced in jnp below and merged.
        p_main, t_main = p_flat[:main], t_flat[:main]
    else:
        p_main, t_main = p_flat, t_flat   # zero-copy reshape
    p2 = p_main.reshape(n_blocks * tr, LANE)
    t2 = t_main.reshape(n_blocks * tr, LANE)

    n_inner = pl.cdiv(n_blocks, n_split)

    def in_map(s_idx, i_idx):
        # Clamp so grid-padding blocks issue a valid (duplicate) DMA; the kernel
        # skips their contribution via pl.when(blk < n_blocks).
        blk = jnp.minimum(s_idx * n_inner + i_idx, n_blocks - 1)
        return (blk, 0)

    partials = pl.pallas_call(
        functools.partial(_smooth_l1_kernel, beta=float(beta),
                          n_blocks=n_blocks, tile_rows=tr),
        out_shape=jax.ShapeDtypeStruct((n_split, 2, SUBLANE, LANE), jnp.float32),
        grid_spec=pltpu.PrefetchScalarGridSpec(
            num_scalar_prefetch=0,
            grid=(n_split, n_inner),
            in_specs=[
                pl.BlockSpec((tr, LANE), in_map),
                pl.BlockSpec((tr, LANE), in_map),
            ],
            out_specs=pl.BlockSpec((1, 2, SUBLANE, LANE),
                                   lambda s_idx, i_idx: (s_idx, 0, 0, 0)),
            scratch_shapes=[
                pltpu.VMEM((SUBLANE, LANE), jnp.float32),   # running masked sum
                pltpu.VMEM((SUBLANE, LANE), jnp.float32),   # running valid count
            ],
        ),
        compiler_params=pltpu.CompilerParams(
            dimension_semantics=("parallel", "arbitrary")),
    )(p2, t2)

    loss_sum = jnp.sum(partials[:, 0])
    loss_cnt = jnp.sum(partials[:, 1])

    if main < total:
        ts, tc = _masked_sum_count(p_flat[main:], t_flat[main:], beta)
        loss_sum = loss_sum + ts
        loss_cnt = loss_cnt + tc

    # 2 * mean over valid elements (inf/nan if no valid element, same as torch).
    return 2.0 * loss_sum / loss_cnt


def _reference(pred, target, beta=1.0):
    pred = pred.astype(jnp.float32)
    target = target.astype(jnp.float32)
    valid = target > 0.0
    diff = jnp.abs(target - pred)
    elem = jnp.where(diff < beta, 0.5 * diff * diff, diff - 0.5 * beta)
    s = jnp.sum(jnp.where(valid, elem, 0.0))
    c = jnp.sum(valid.astype(jnp.float32))
    return 2.0 * s / c


if __name__ == "__main__":
    key = jax.random.PRNGKey(0)
    kp, kt = jax.random.split(key)

    # NCHW, small shapes consistent with a dense-prediction loss input.
    shape = (2, 4, 16, 16)
    pred = jax.random.normal(kp, shape, dtype=jnp.float32)
    # target: mix of positive (valid) and non-positive (masked) values
    target = jax.random.normal(kt, shape, dtype=jnp.float32) * 2.0

    loss = jax.block_until_ready(smooth_l1_loss(pred, target, beta=1.0))
    ref = jax.block_until_ready(_reference(pred, target, beta=1.0))
    assert jnp.allclose(loss, ref, rtol=1e-5, atol=1e-5), (loss, ref)

    # Second check: ragged shape exercising the jnp tail path + block clamping.
    shape2 = (3, 5, 37, 29)
    kp2, kt2 = jax.random.split(kt)
    pred2 = jax.random.normal(kp2, shape2, dtype=jnp.float32)
    target2 = jax.random.normal(kt2, shape2, dtype=jnp.float32) * 2.0
    loss2 = jax.block_until_ready(smooth_l1_loss(pred2, target2, beta=1.0))
    ref2 = jax.block_until_ready(_reference(pred2, target2, beta=1.0))
    assert jnp.allclose(loss2, ref2, rtol=1e-5, atol=1e-5), (loss2, ref2)

    print("KERNEL_OK")
</pallas_src>

<mosaic_0001>
module attributes {stable_mosaic.version = 11 : i64} {
  func.func @_smooth_l1_kernel(%arg0: i32, %arg1: i32, %arg2: memref<16x128xf32, #tpu.memory_space<vmem>>, %arg3: memref<16x128xf32, #tpu.memory_space<vmem>>, %arg4: memref<1x2x8x128xf32, #tpu.memory_space<vmem>>, %arg5: memref<8x128xf32, #tpu.memory_space<vmem>>, %arg6: memref<8x128xf32, #tpu.memory_space<vmem>>) attributes {dimension_semantics = [#tpu.dimension_semantics<parallel>, #tpu.dimension_semantics<arbitrary>], iteration_bounds = array<i64: 2, 1>, scalar_prefetch = 0 : i64, scratch_operands = 2 : i64, tpu.core_type = #tpu.core_type<tc>, window_params = [{transform_indices = @transform_0, window_bounds = array<i64: 16, 128>}, {transform_indices = @transform_1, window_bounds = array<i64: 16, 128>}, {transform_indices = @transform_2, window_bounds = array<i64: 1, 2, 8, 128>}]} {
    %c0_i32 = arith.constant 0 : i32
    %0 = arith.cmpi eq, %arg1, %c0_i32 : i32
    %1 = arith.extui %0 : i1 to i32
    %c0_i32_0 = arith.constant 0 : i32
    %2 = arith.cmpi ne, %1, %c0_i32_0 : i32
    scf.if %2 {
      %cst = arith.constant 0.000000e+00 : f32
      %11 = vector.broadcast %cst : f32 to vector<8x128xf32>
      %c0 = arith.constant 0 : index
      %c0_5 = arith.constant 0 : index
      %12 = vector.load %arg5[%c0, %c0_5] : memref<8x128xf32, #tpu.memory_space<vmem>>, vector<8x128xf32>
      tpu.vector_store %arg5[%c0, %c0_5], %11 {strides = array<i32>} : memref<8x128xf32, #tpu.memory_space<vmem>>, vector<8x128xf32>,
      %cst_6 = arith.constant 0.000000e+00 : f32
      %13 = vector.broadcast %cst_6 : f32 to vector<8x128xf32>
      %c0_7 = arith.constant 0 : index
      %c0_8 = arith.constant 0 : index
      %14 = vector.load %arg6[%c0_7, %c0_8] : memref<8x128xf32, #tpu.memory_space<vmem>>, vector<8x128xf32>
      tpu.vector_store %arg6[%c0_7, %c0_8], %13 {strides = array<i32>} : memref<8x128xf32, #tpu.memory_space<vmem>>, vector<8x128xf32>,
    } else {
    }
    %c1_i32 = arith.constant 1 : i32
    %3 = arith.muli %arg0, %c1_i32 : i32
    %4 = arith.addi %3, %arg1 : i32
    %c1_i32_1 = arith.constant 1 : i32
    %5 = arith.cmpi slt, %4, %c1_i32_1 : i32
    %6 = arith.extui %5 : i1 to i32
    %c0_i32_2 = arith.constant 0 : i32
    %7 = arith.cmpi ne, %6, %c0_i32_2 : i32
    scf.if %7 {
      %c0 = arith.constant 0 : index
      %c0_5 = arith.constant 0 : index
      %11 = vector.load %arg3[%c0, %c0_5] : memref<16x128xf32, #tpu.memory_space<vmem>>, vector<16x128xf32>
      %c0_6 = arith.constant 0 : index
      %c0_7 = arith.constant 0 : index
      %12 = vector.load %arg2[%c0_6, %c0_7] : memref<16x128xf32, #tpu.memory_space<vmem>>, vector<16x128xf32>
      %cst = arith.constant 0.000000e+00 : f32
      %13 = vector.broadcast %cst : f32 to vector<16x128xf32>
      %14 = arith.cmpf ogt, %11, %13 : vector<16x128xf32>
      %15 = arith.subf %11, %12 : vector<16x128xf32>
      %16 = math.absf %15 : vector<16x128xf32>
      %cst_8 = arith.constant 1.000000e+00 : f32
      %17 = vector.broadcast %cst_8 : f32 to vector<16x128xf32>
      %18 = arith.cmpf olt, %16, %17 : vector<16x128xf32>
      %cst_9 = arith.constant 5.000000e-01 : f32
      %19 = vector.broadcast %cst_9 : f32 to vector<16x128xf32>
      %20 = arith.mulf %19, %16 : vector<16x128xf32>
      %21 = arith.mulf %20, %16 : vector<16x128xf32>
      %cst_10 = arith.constant 5.000000e-01 : f32
      %22 = vector.broadcast %cst_10 : f32 to vector<16x128xf32>
      %23 = arith.subf %16, %22 : vector<16x128xf32>
      %24 = arith.select %18, %21, %23 : vector<16x128xi1>, vector<16x128xf32>
      %cst_11 = arith.constant 0.000000e+00 : f32
      %25 = vector.broadcast %cst_11 : f32 to vector<16x128xf32>
      %26 = arith.select %14, %24, %25 : vector<16x128xi1>, vector<16x128xf32>
      %27 = arith.extui %14 : vector<16x128xi1> to vector<16x128xi32>
      %28 = arith.sitofp %27 : vector<16x128xi32> to vector<16x128xf32>
      %c0_12 = arith.constant 0 : index
      %c0_13 = arith.constant 0 : index
      %29 = vector.load %arg5[%c0_12, %c0_13] : memref<8x128xf32, #tpu.memory_space<vmem>>, vector<8x128xf32>
      %30 = vector.shape_cast %26 : vector<16x128xf32> to vector<2x8x128xf32>
      %cst_14 = arith.constant dense<0.000000e+00> : vector<8x128xf32>
      %31 = vector.multi_reduction <add>, %30, %cst_14 [0] : vector<2x8x128xf32> to vector<8x128xf32>
      %32 = arith.addf %29, %31 : vector<8x128xf32>
      %c0_15 = arith.constant 0 : index
      %c0_16 = arith.constant 0 : index
      %33 = vector.load %arg5[%c0_15, %c0_16] : memref<8x128xf32, #tpu.memory_space<vmem>>, vector<8x128xf32>
      tpu.vector_store %arg5[%c0_15, %c0_16], %32 {strides = array<i32>} : memref<8x128xf32, #tpu.memory_space<vmem>>, vector<8x128xf32>,
      %c0_17 = arith.constant 0 : index
      %c0_18 = arith.constant 0 : index
      %34 = vector.load %arg6[%c0_17, %c0_18] : memref<8x128xf32, #tpu.memory_space<vmem>>, vector<8x128xf32>
      %35 = vector.shape_cast %28 : vector<16x128xf32> to vector<2x8x128xf32>
      %cst_19 = arith.constant dense<0.000000e+00> : vector<8x128xf32>
      %36 = vector.multi_reduction <add>, %35, %cst_19 [0] : vector<2x8x128xf32> to vector<8x128xf32>
      %37 = arith.addf %34, %36 : vector<8x128xf32>
      %c0_20 = arith.constant 0 : index
      %c0_21 = arith.constant 0 : index
      %38 = vector.load %arg6[%c0_20, %c0_21] : memref<8x128xf32, #tpu.memory_space<vmem>>, vector<8x128xf32>
      tpu.vector_store %arg6[%c0_20, %c0_21], %37 {strides = array<i32>} : memref<8x128xf32, #tpu.memory_space<vmem>>, vector<8x128xf32>,
    } else {
    }
    %c0_i32_3 = arith.constant 0 : i32
    %8 = arith.cmpi eq, %arg1, %c0_i32_3 : i32
    %9 = arith.extui %8 : i1 to i32
    %c0_i32_4 = arith.constant 0 : i32
    %10 = arith.cmpi ne, %9, %c0_i32_4 : i32
    scf.if %10 {
      %c0 = arith.constant 0 : index
      %c0_5 = arith.constant 0 : index
      %11 = vector.load %arg5[%c0, %c0_5] : memref<8x128xf32, #tpu.memory_space<vmem>>, vector<8x128xf32>
      %c0_6 = arith.constant 0 : index
      %c0_7 = arith.constant 0 : index
      %c0_8 = arith.constant 0 : index
      %c0_9 = arith.constant 0 : index
      %12 = vector.load %arg4[%c0_6, %c0_7, %c0_8, %c0_9] : memref<1x2x8x128xf32, #tpu.memory_space<vmem>>, vector<1x1x8x128xf32>
      %13 = vector.shape_cast %12 : vector<1x1x8x128xf32> to vector<8x128xf32>
      %14 = vector.shape_cast %11 : vector<8x128xf32> to vector<1x1x8x128xf32>
      tpu.vector_store %arg4[%c0_6, %c0_7, %c0_8, %c0_9], %14 {strides = array<i32>} : memref<1x2x8x128xf32, #tpu.memory_space<vmem>>, vector<1x1x8x128xf32>,
      %c0_10 = arith.constant 0 : index
      %c0_11 = arith.constant 0 : index
      %15 = vector.load %arg6[%c0_10, %c0_11] : memref<8x128xf32, #tpu.memory_space<vmem>>, vector<8x128xf32>
      %c0_12 = arith.constant 0 : index
      %c1 = arith.constant 1 : index
      %c0_13 = arith.constant 0 : index
      %c0_14 = arith.constant 0 : index
      %16 = vector.load %arg4[%c0_12, %c1, %c0_13, %c0_14] : memref<1x2x8x128xf32, #tpu.memory_space<vmem>>, vector<1x1x8x128xf32>
      %17 = vector.shape_cast %16 : vector<1x1x8x128xf32> to vector<8x128xf32>
      %18 = vector.shape_cast %15 : vector<8x128xf32> to vector<1x1x8x128xf32>
      tpu.vector_store %arg4[%c0_12, %c1, %c0_13, %c0_14], %18 {strides = array<i32>} : memref<1x2x8x128xf32, #tpu.memory_space<vmem>>, vector<1x1x8x128xf32>,
    } else {
    }
    return
  }
  func.func @transform_0(%arg0: i32, %arg1: i32) -> (i32, i32) {
    %c1_i32 = arith.constant 1 : i32
    %0 = arith.muli %arg0, %c1_i32 : i32
    %1 = arith.addi %0, %arg1 : i32
    %c0_i32 = arith.constant 0 : i32
    %2 = arith.minsi %1, %c0_i32 : i32
    %c0_i32_0 = arith.constant 0 : i32
    %c0_i32_1 = arith.constant 0 : i32
    return %2, %c0_i32_0 : i32, i32
  }
  func.func @transform_1(%arg0: i32, %arg1: i32) -> (i32, i32) {
    %c1_i32 = arith.constant 1 : i32
    %0 = arith.muli %arg0, %c1_i32 : i32
    %1 = arith.addi %0, %arg1 : i32
    %c0_i32 = arith.constant 0 : i32
    %2 = arith.minsi %1, %c0_i32 : i32
    %c0_i32_0 = arith.constant 0 : i32
    %c0_i32_1 = arith.constant 0 : i32
    return %2, %c0_i32_0 : i32, i32
  }
  func.func @transform_2(%arg0: i32, %arg1: i32) -> (i32, i32, i32, i32) {
    %c0_i32 = arith.constant 0 : i32
    %c0_i32_0 = arith.constant 0 : i32
    %c0_i32_1 = arith.constant 0 : i32
    %c0_i32_2 = arith.constant 0 : i32
    return %arg0, %c0_i32, %c0_i32_0, %c0_i32_1 : i32, i32, i32, i32
  }
}

</mosaic_0001>

<bundles_post_ra>
// kernel: tpu_custom_call.1
= control target key start
LH: loop header
LB: loop body
LE: loop exit
PB: predicated region body
PF: predicated region fallthrough
CT: control target
= control target key end

     0   :  { %7 = vsyncpa [#allocation5], 0  ;;  %s930_s0 = inlined_call_operand.hbm [shape: f32[16,128], index: 0, kind: input, shape index: {}]   ;;  %s931_s1 = inlined_call_operand.hbm [shape: f32[16,128], index: 1, kind: input, shape index: {}]   ;;  %s932_s2 = inlined_call_operand.hbm [shape: f32[2,2,8,128], index: 2, kind: output, shape index: {}]  }
   0x1   :  { %9 = vsyncpa [#allocation5 + $0x1], 0 }
   0x2   :  { %10 = vsyncpa [#allocation8], 0 }
   0x3   :  { %12 = vsyncpa [#allocation8 + $0x1], 0 }
   0x4   :  { %13 = vsyncpa [#allocation6], 0 }
   0x5   :  { %15 = vsyncpa [#allocation6 + $0x1], 0  ;;  %s723_s9 = smov 0   ;;  %s725_s10 = smov 0  }
   0x6   :  { %s727_s11 = smov 0   ;;  %s729_s12 = smov 0  }
   0x7   :  { %s731_s13 = smov 0   ;;  %s733_s14 = smov 0  }
   0x8   :  { %s735_s15 = smov 0   ;;  %s737_s16 = smov 0  }
   0x9 LB: > { %s411_s17 = sadd.s32 4294967295, %s697_s16   ;;  %s412_s18 = sadd.s32 4294967294, %s697_s16   ;;  %s697_s16 = sphi %s737_s16, %s21_s16   ;;  %s693_s15 = sphi %s735_s15, %s951_s15   ;;  %s689_s14 = sphi %s733_s14, %s950_s14   ;;  %s685_s13 = sphi %s731_s13, %s920_s13   ;;  %s681_s12 = sphi %s729_s12, %s949_s12   ;;  %s677_s11 = sphi %s727_s11, %s948_s11   ;;  %s673_s10 = sphi %s725_s10, %s947_s10   ;;  %s669_s9 = sphi %s723_s9, %s946_s9  }
   0xa   : > { %s33_s19 = sadd.s32 1, %s693_s15  ;;  %p666_p1 = scmp.ne.s32.totalorder %s685_s13, 0 }
   0xb   : > { %p35_p0 = scmp.ge.s32.totalorder %s33_s19, 2  ;;  %p54_p2 = scmp.eq.s32.totalorder %s697_s16, 0 }
   0xc   : > { %p59_p3 = scmp.ne.s32.totalorder %s685_s13, %s681_s12  ;;  %p60_p5 = scmp.eq.s32.totalorder %s411_s17, 0 }
   0xd   : > { %s953_s19 = smov (%p35_p0, %s33_s19), 0  ;;  %p769_p4 = por %p666_p1, %p54_p2 }
   0xe   : > { %p773_p6 = por %p60_p5, %p59_p3  ;;  %s101_s22 = ssub.s32 %s693_s15, %s953_s19 }
   0xf   : > { %p102_p7 = scmp.eq.s32.totalorder %s101_s22, 0  ;;  %s104_s23 = sadd.s32 1, %s677_s11 }
  0x10   : > { %s936_s21 = scalar_select %p773_p6, 1, 0 }
  0x11   : > { %s781_s24 = scalar_select %p102_p7, %s677_s11, %s104_s23  }
  0x12   : > { %p114_p8 = scmp.ne.s32.totalorder %s677_s11, %s673_s10  ;;  %p115_p9 = scmp.eq.s32.totalorder %s411_s17, 1 }
  0x13   : > { %p120_p10 = scmp.ne.s32.totalorder %s673_s10, %s669_s9  ;;  %p121_p11 = scmp.eq.s32.totalorder %s412_s18, 1 }
  0x14   : > { %p787_p12 = por %p115_p9, %p114_p8  ;;  %p456_p1 = scmp.lt.s32.totalorder %s697_s16, 2 }
  0x15   : > { %p792_p0 = por %p121_p11, %p120_p10  ;;  %s699_s27 = smov [#allocation4]  }
  0x16   : > { %s937_s25 = scalar_select %p787_p12, 1, 0 }
  0x17   : > { %s938_s26 = scalar_select %p792_p0, 1, 0 }
  0x18   : > { %s155_s28 = sshll.u32 %s699_s27, 4  ;;  %p799_p2 = pnand %p456_p1, %p769_p4  ;;  %s156_s28 = int_to_ptr.vmem [resolvable:$true] %s155_s28 }
  0x19   : > { %s536_s4 = scalar_lea.hbm %s930_s0, 256 }
  0x1a   : > { %p537_p3 = scmp.ne.s32.totalorder %s930_s0, %s536_s4  ;;  %p538_p5 = pneg %p799_p2 }
  0x1b   : > { %p543_p8 = scmp.lt.s32.totalorder %s536_s4, %s536_s4 }
  0x1c   : > { %p539_p7 = pnand %p538_p5, %p537_p3 }
  0x1e   : > { %p540_p4 = pneg %p539_p7 }
  0x20   : > { %p545_p9 = pnand %p543_p8, %p540_p4 }
  0x22   : > { %548 = shalt.err (!%p545_p9)
}
  0x23   : > { %s549_s7 = scalar_lea.vmem %s156_s28, 256  ;;  %s556_s8 = scalar_lea.vmem %s156_s28, 512 }
  0x24   : > { %p550_p10 = scmp.ne.s32.totalorder %s156_s28, %s549_s7  ;;  %p557_p13 = scmp.lt.s32.totalorder %s156_s28, %s156_s28 }
  0x25   : > { %p558_p0 = scmp.lt.s32.totalorder %s556_s8, %s549_s7 }
  0x26   : > { %p552_p11 = pnand %p550_p10, %p538_p5 }
  0x27   : > { %p559_p12 = por %p558_p0, %p557_p13 }
  0x28   : > { %p553_p1 = pneg %p552_p11 }
  0x2a   : > { %p560_p6 = pnand %p559_p12, %p553_p1 }
  0x2c   : > { %563 = shalt.err (!%p560_p6)
}
  0x2d   : > { %s700_s12 = smov 128   ;;  %s701_s17 = smov 8  }
  0x2e   : > { %448 = dma.hbm_to_vmem [thread:$0]  (!%p799_p2), %s930_s0, 256, %s156_s28, [#allocation5], %s700_s12, %s700_s12, %s701_s17  }
  0x2f   : > { %p421_p3 = scmp.ge.s32.totalorder %s697_s16, 1  ;;  %p187_p7 = scmp.lt.s32.totalorder %s697_s16, 3 }
  0x30   : > { %s702_s23 = smov [#allocation7]   ;;  %s564_s4 = scalar_lea.hbm %s931_s1, 256 }
  0x31   : > { %p824_p4 = pnand %p421_p3, %p187_p7  ;;  %s179_s27 = sshll.u32 %s702_s23, 4  ;;  %s180_s27 = int_to_ptr.vmem [resolvable:$true] %s179_s27 }
  0x32   : > { %p565_p6 = scmp.ne.s32.totalorder %s931_s1, %s564_s4  ;;  %p571_p0 = scmp.lt.s32.totalorder %s564_s4, %s564_s4 }
  0x33   : > { %s940_s22 = scalar_select %p824_p4, 1, 0 }
  0x34   : > { %p567_p12 = pnand %p565_p6, %p538_p5 }
  0x36   : > { %p568_p13 = pneg %p567_p12 }
  0x38   : > { %p573_p8 = pnand %p571_p0, %p568_p13 }
  0x3a   : > { %576 = shalt.err (!%p573_p8)
}
  0x3b   : > { %s577_s28 = scalar_lea.vmem %s180_s27, 256  ;;  %s584_s7 = scalar_lea.vmem %s180_s27, 512 }
  0x3c   : > { %p578_p9 = scmp.ne.s32.totalorder %s180_s27, %s577_s28  ;;  %p585_p1 = scmp.lt.s32.totalorder %s180_s27, %s180_s27 }
  0x3d   : > { %p586_p3 = scmp.lt.s32.totalorder %s584_s7, %s577_s28 }
  0x3e   : > { %p580_p10 = pnand %p578_p9, %p538_p5 }
  0x3f   : > { %p587_p7 = por %p586_p3, %p585_p1 }
  0x40   : > { %p581_p11 = pneg %p580_p10 }
  0x42   : > { %p588_p4 = pnand %p587_p7, %p581_p11 }
  0x44   : > { %591 = shalt.err (!%p588_p4)
}
  0x45   : > { %451 = dma.hbm_to_vmem [thread:$0]  (!%p799_p2), %s931_s1, 256, %s180_s27, [#allocation8], %s700_s12, %s700_s12, %s701_s17  }
  0x46   : > { %p941_p6 = scmp.ne.s32.totalorder %s940_s22, 0 }
  0x47   : > { %s193_s20 = sand.u32 (!%p941_p6), 1, %s685_s13   ;;  %p942_p5 = scmp.ne.s32.totalorder (!%p941_p6), %s936_s21, 0 }
  0x48   : > { %191 = sbr.rel (%p941_p6) target bundleno = 129 (0x81), region = 28  ;;  %s422_s23 = sshll.u32 (!%p941_p6), %s193_s20, 4 }
  0x49   : > { %s194_s30 = scalar_lea.sflag (!%p941_p6), [#allocation5], %s193_s20  ;;  %s197_s3 = scalar_lea.vmem (!%p941_p6), [#allocation4], %s422_s23 }
  0x4d   : > { %655 = dma.done.wait (%p942_p5), %s194_s30, 256  }
  0x4e   : > { %657 = vsyncadd (%p942_p5), %s194_s30, 4294967040  ;;  %s203_s29 = scalar_lea.sflag [#allocation8], %s193_s20  ;;  %s206_s4 = scalar_lea.vmem [#allocation7], %s422_s23 }
  0x4f   : > { %659 = dma.done.wait (%p942_p5), %s203_s29, 256  }
  0x50   : > { %661 = vsyncadd (%p942_p5), %s203_s29, 4294967040  ;;  %s229_s12 = sand.u32 1, %s673_s10   ;;  %v703_v0 = vmov 0.0   ;;  %p425_p2 = scmp.ge.s32.totalorder %s689_s14, 1 }
  0x51   : > { %s424_s17 = sshll.u32 %s229_s12, 4  ;;  %244 = vst [vmem:[#allocation2] sm:$0xff] %v703_v0  ;;  %245 = vst [vmem:[#allocation3] sm:$0xff] %v703_v0 }
  0x52   : > { %s859_s22 = scalar_lea.vmem [#allocation9], %s424_s17  ;;  %250 = sbr.rel (%p425_p2) target bundleno = 104 (0x68), region = 44 }
  0x57   : > { %v251_v1 = vld [vmem:[%s206_s4] sm:$0xff]  ;;  %v252_v2 = vld [vmem:[%s206_s4 + $0x8] sm:$0xff]  ;;  %v704_v7 = vmov 0.0  }
  0x58   : > { %v253_v3 = vld [vmem:[%s197_s3] sm:$0xff]  ;;  %v254_v4 = vld [vmem:[%s197_s3 + $0x8] sm:$0xff]  ;;  %vm255_vm0 = vcmp.gt.f32.partialorder %v251_v1, 0.0  ;;  %vm256_vm1 = vcmp.gt.f32.partialorder %v252_v2, 0.0 }
  0x59   : > { %v257_v5 = vsub.f32 %v251_v1, %v253_v3  ;;  %v258_v6 = vsub.f32 %v252_v2, %v254_v4  ;;  %v428_v8 = vsel %vm255_vm0, 1.0, %v704_v7  ;;  %v429_v9 = vsel %vm256_vm1, 1.0, %v704_v7  ;;  %v281_v10 = vld [vmem:[#allocation3] sm:$0xff]  ;;  %v277_v25 = vld [vmem:[#allocation2] sm:$0xff] }
  0x5a   : > { %v282_v12 = vadd.f32 %v429_v9, %v428_v8 }
  0x5b   : > { %v259_v11 = vand.u32 2147483647, %v257_v5  ;;  %v260_v13 = vand.u32 2147483647, %v258_v6 }
  0x5c   : > { %v283_v16 = vadd.f32 %v282_v12, %v281_v10 }
  0x5d   : > { %v263_v14 = vmul.f32 0.5, %v259_v11  ;;  %v426_v15 = vadd.f32 -0.5, %v259_v11  ;;  %vm261_vm2 = vcmp.lt.f32.partialorder %v259_v11, 1.0  ;;  %v264_v17 = vmul.f32 0.5, %v260_v13 }
  0x5e   : > { %v427_v18 = vadd.f32 -0.5, %v260_v13  ;;  %vm262_vm3 = vcmp.lt.f32.partialorder %v260_v13, 1.0  ;;  %284 = vst [vmem:[#allocation3] sm:$0xff] %v283_v16 }
  0x5f   : > { %v265_v19 = vmul.f32 %v263_v14, %v259_v11  ;;  %v266_v20 = vmul.f32 %v264_v17, %v260_v13 }
  0x61   : > { %v269_v21 = vsel %vm261_vm2, %v265_v19, %v426_v15  ;;  %v270_v22 = vsel %vm262_vm3, %v266_v20, %v427_v18 }
  0x62   : > { %v271_v23 = vsel %vm255_vm0, %v269_v21, 0.0  ;;  %v272_v24 = vsel %vm256_vm1, %v270_v22, 0.0 }
  0x63   : > { %v278_v26 = vadd.f32 %v272_v24, %v271_v23 }
  0x65   : > { %v279_v27 = vadd.f32 %v278_v26, %v277_v25 }
  0x67   : > { %280 = vst [vmem:[#allocation2] sm:$0xff] %v279_v27 }
  0x68 PF: > { %s438_s21 = sshll.u32 %s689_s14, 8  ;;  %s307_s28 = sshll.u32 %s859_s22, 4  ;;  %s875_s28 = int_to_ptr.vmem [resolvable:$true] %s307_s28 }
  0x69   : > { %v290_v29 = vld [vmem:[#allocation3] sm:$0xff]  ;;  %s872_s6 = scalar_lea.hbm %s932_s2, %s438_s21  ;;  %s879_s7 = scalar_lea.sflag [#allocation6], %s229_s12 }
  0x6a   : > { %430 = vst [vmem:[%s859_s22 + $0x8] sm:$0xff] %v290_v29  ;;  %s592_s8 = scalar_lea.vmem %s875_s28, 256  ;;  %p943_p12 = scmp.ne.s32.totalorder %s937_s25, 0 }
  0x6b   : > { %p593_p4 = scmp.ne.s32.totalorder %s875_s28, %s592_s8  ;;  %s705_s14 = smov [#allocation9]  }
  0x6c   : > { %s596_s18 = sshll.u32 %s705_s14, 4  ;;  %s597_s18 = int_to_ptr.vmem [resolvable:$false] %s596_s18 }
  0x6d   : > { %p594_p13 = pnand %p593_p4, %p943_p12  ;;  %s598_s20 = scalar_lea.vmem %s597_s18, 512 }
  0x6e   : > { %v288_v28 = vld [vmem:[#allocation2] sm:$0xff]  ;;  %p599_p8 = scmp.lt.s32.totalorder %s875_s28, %s597_s18  ;;  %p600_p9 = scmp.lt.s32.totalorder %s598_s20, %s592_s8 }
  0x6f   : > { %289 = vst [vmem:[%s859_s22] sm:$0xff] %v288_v28  ;;  %p595_p0 = pneg %p594_p13 }
  0x70   : > { %p601_p10 = por %p600_p9, %p599_p8 }
  0x72   : > { %p602_p11 = pnand %p601_p10, %p595_p0 }
  0x74   : > { %605 = shalt.err (!%p602_p11)
}
  0x75   : > { %s606_s23 = scalar_lea.hbm %s872_s6, 256  ;;  %s610_s29 = scalar_lea.hbm %s932_s2, 512 }
  0x76   : > { %p607_p1 = scmp.ne.s32.totalorder %s872_s6, %s606_s23  ;;  %p611_p6 = scmp.lt.s32.totalorder %s872_s6, %s932_s2 }
  0x77   : > { %p612_p5 = scmp.lt.s32.totalorder %s610_s29, %s606_s23 }
  0x78   : > { %p608_p3 = pnand %p607_p1, %p943_p12 }
  0x79   : > { %p613_p2 = por %p612_p5, %p611_p6 }
  0x7a   : > { %p609_p7 = pneg %p608_p3 }
  0x7c   : > { %p614_p4 = pnand %p613_p2, %p609_p7 }
  0x7e   : > { %617 = shalt.err (!%p614_p4)
}
  0x7f   : > { %s706_s17 = smov 128   ;;  %s707_s22 = smov 8  }
  0x80   : > { %443 = dma.vmem_to_hbm [thread:$0]  (%p943_p12), %s875_s28, 256, %s872_s6, %s879_s7, %s706_s17, %s706_s17, %s707_s22  }
  0x81 PF: > { %s322_s21 = sand.u32 1, %s669_s9   ;;  %p944_p13 = scmp.ne.s32.totalorder %s938_s26, 0 }
  0x82   : > { %p945_p0 = scmp.ge.s32.totalorder %s697_s16, 2  ;;  %s323_s27 = scalar_lea.sflag [#allocation6], %s322_s21 }
  0x84   : > { %p453_p8 = pnand %p945_p0, %p944_p13 }
  0x86   : > { %p454_p9 = pneg %p453_p8 }
  0x88   : > { %663 = dma.done.wait (%p454_p9), %s323_s27, 256  }
  0x89   : > { %665 = vsyncadd (%p454_p9), %s323_s27, 4294967040  ;;  %s21_s16 = sadd.s32 1, %s697_s16   ;;  %s946_s9 = smov %s673_s10 }
  0x8a   : > { %p18_p10 = scmp.ge.s32.totalorder %s21_s16, 4   ;;  %s947_s10 = smov %s677_s11 }
  0x8b   : > { %s948_s11 = smov %s781_s24  ;;  %s949_s12 = smov %s685_s13 }
  0x8c   : > { %s920_s13 = smov 0   ;;  %s950_s14 = smov %s693_s15 }
  0x8d   : > { %s951_s15 = smov %s953_s19  ;;  %20 = sbr.rel (!%p18_p10) target bundleno = 9 (0x9), region = 99 }
  0x92   :  { %328 = vsyncpa [#allocation5], 1 }
  0x93   :  { %330 = vsyncpa [#allocation5 + $0x1], 1 }
  0x94   :  { %331 = vsyncpa [#allocation8], 1 }
  0x95   :  { %333 = vsyncpa [#allocation8 + $0x1], 1 }
  0x96   :  { %334 = vsyncpa [#allocation6], 1 }
  0x97   :  { %336 = vsyncpa [#allocation6 + $0x1], 1 }

</bundles_post_ra>
